<compile_context>
chip_gen: v6e
topology: v6e:2x2x1
jax: 0.10.0
libtpu: 0.0.40
codegen_flags: <defaults>
</compile_context>

<pallas_src>
import functools
import math

import jax
import jax.numpy as jnp
from jax.experimental import pallas as pl
from jax.experimental.pallas import tpu as pltpu


def _cdiv(a, b):
    return -(-a // b)


def _vmem_params():
    """(tile budget bytes, vmem_limit_bytes) parameterized by TPU generation."""
    cap = 64 * 1024 * 1024
    try:
        info = pltpu.get_tpu_info()
        cap = int(getattr(info, "vmem_capacity_bytes", cap)) or cap
    except Exception:
        pass
    if cap >= 128 * 1024 * 1024:          # v5e / v6e: 128 MiB VMEM
        return 48 * 1024 * 1024, 100 * 1024 * 1024
    return 20 * 1024 * 1024, 48 * 1024 * 1024   # v7x: 64 MiB VMEM


# --------------------------- fused Pallas kernel ---------------------------- #
def _fused_pixel_shuffle_kernel(x_ref, w_ref, b_ref, o_ref, *, co, width):
    # x_ref: (Cin, rows*W)    activations, spatial on lanes (lane-dense loads)
    # w_ref: (4*Co, Cin)      weight rows ordered (ki, kj, co); stays resident
    # b_ref: (4*Co, 1)        bias per weight row
    # o_ref: (Co, rows*4*W)   final NCHW data for `rows` input rows (lane-dense)
    rows = x_ref.shape[1] // width
    acc = jnp.dot(w_ref[...], x_ref[...], preferred_element_type=jnp.float32)
    acc = acc + b_ref[...]
    t00 = acc[0 * co:1 * co, :]    # tap (ki=0, kj=0)
    t01 = acc[1 * co:2 * co, :]    # tap (0, 1)
    t10 = acc[2 * co:3 * co, :]    # tap (1, 0)
    t11 = acc[3 * co:4 * co, :]    # tap (1, 1)
    # kj interleave (element granularity): r_ki[c, i, 2j+kj] = t_{ki,kj}[c, i*W+j]
    r0 = jnp.stack([t00, t01], axis=-1).reshape(co, rows, 2 * width)
    r1 = jnp.stack([t10, t11], axis=-1).reshape(co, rows, 2 * width)
    # ki interleave (2W-chunk granularity): flat index 4W*i + 2W*ki + 2j + kj
    y = jnp.stack([r0, r1], axis=2).reshape(co, rows * 4 * width)
    o_ref[...] = y.astype(o_ref.dtype)


def _pick_rows(h, w, cin, co, n, budget_bytes):
    """Input rows per grid step for the fused kernel.

    For rows < H the x / out blocks' lane widths (rows*W, rows*4W) must be
    multiples of 128, i.e. rows must be a multiple of 128/gcd(128, W)."""
    co4 = 4 * co

    def est(r):  # 2 pipeline buffers x 4B for x/out blocks + resident w/b
        return 8 * r * w * (cin + co4) + 8 * co4 * (cin + 1)

    step = 128 // math.gcd(128, w)
    rows = h
    if est(h) > budget_bytes and step <= h:
        r = (budget_bytes - 8 * co4 * (cin + 1)) // max(1, 8 * w * (cin + co4))
        r = (r // step) * step
        rows = min(h, max(step, r))
    # v7x megacore: ensure >= 2 grid programs when it is legal to split.
    if n * _cdiv(h, rows) < 2:
        half = (_cdiv(h, 2) // step) * step
        if step <= half < rows:
            rows = half
    return rows


@jax.jit
def _forward_fused(x, weight, bias):
    n, cin, h, w = x.shape
    _, co, kh, kw_ = weight.shape
    budget, limit = _vmem_params()

    x3 = x.reshape(n, cin, h * w)                                  # free reshape
    # (Cin, Co, 2, 2) -> (4*Co, Cin), rows ordered (ki, kj, co).
    w2 = jnp.transpose(weight, (2, 3, 1, 0)).reshape(kh * kw_ * co, cin)
    b2 = jnp.tile(bias, (kh * kw_,)).reshape(kh * kw_ * co, 1)

    rows = _pick_rows(h, w, cin, co, n, budget)
    y = pl.pallas_call(
        functools.partial(_fused_pixel_shuffle_kernel, co=co, width=w),
        out_shape=jax.ShapeDtypeStruct((n, co, 4 * h * w), x.dtype),
        grid_spec=pltpu.PrefetchScalarGridSpec(
            num_scalar_prefetch=0,
            grid=(n, _cdiv(h, rows)),
            in_specs=[
                pl.BlockSpec((None, cin, rows * w), lambda b, s: (b, 0, s)),   # x
                pl.BlockSpec((4 * co, cin), lambda b, s: (0, 0)),              # weight
                pl.BlockSpec((4 * co, 1), lambda b, s: (0, 0)),                # bias
            ],
            out_specs=pl.BlockSpec((None, co, rows * 4 * w),
                                   lambda b, s: (b, 0, s)),
        ),
        compiler_params=pltpu.CompilerParams(
            dimension_semantics=("parallel", "parallel"),
            vmem_limit_bytes=limit,
        ),
    )(x3, w2, b2)
    # (N, Co, 4*H*W) is already flat NCHW data -> free reshape.
    return y.reshape(n, co, 2 * h, 2 * w)


# ------------------------- unfused fallback kernel -------------------------- #
def _matmul_bias_kernel(x_ref, w_ref, b_ref, o_ref):
    acc = jnp.dot(w_ref[...], x_ref[...], preferred_element_type=jnp.float32)
    o_ref[...] = (acc + b_ref[...]).astype(o_ref.dtype)


def _pick_spatial_tile(hw, cin, co4, budget_bytes):
    def est(t):
        return 8 * t * (cin + co4) + 8 * co4 * (cin + 1)

    if est(hw) <= budget_bytes or hw <= 128:
        return hw
    t = (budget_bytes - 8 * co4 * (cin + 1)) // max(1, 8 * (cin + co4))
    t = (t // 128) * 128
    return max(128, min(t, (hw // 128) * 128))


def _conv_transpose_matmul(x3, w2, b2, budget, limit):
    n, cin, hw = x3.shape
    co4 = w2.shape[0]
    ts = _pick_spatial_tile(hw, cin, co4, budget)
    return pl.pallas_call(
        _matmul_bias_kernel,
        out_shape=jax.ShapeDtypeStruct((n, co4, hw), x3.dtype),
        grid_spec=pltpu.PrefetchScalarGridSpec(
            num_scalar_prefetch=0,
            grid=(n, _cdiv(hw, ts)),
            in_specs=[
                pl.BlockSpec((None, cin, ts), lambda b, s: (b, 0, s)),
                pl.BlockSpec((co4, cin), lambda b, s: (0, 0)),
                pl.BlockSpec((co4, 1), lambda b, s: (0, 0)),
            ],
            out_specs=pl.BlockSpec((None, co4, ts), lambda b, s: (b, 0, s)),
        ),
        compiler_params=pltpu.CompilerParams(
            dimension_semantics=("parallel", "parallel"),
            vmem_limit_bytes=limit,
        ),
    )(x3, w2, b2)


@jax.jit
def _forward_unfused(x, weight, bias):
    n, cin, h, w = x.shape
    _, co, kh, kw_ = weight.shape
    budget, limit = _vmem_params()

    x3 = x.reshape(n, cin, h * w)
    # Rows ordered (co, ki, kj): the post-kernel XLA pixel-shuffle keeps N, Co
    # as untouched major dims (cheaper transpose).
    w2 = jnp.transpose(weight, (1, 2, 3, 0)).reshape(co * kh * kw_, cin)
    b2 = jnp.repeat(bias, kh * kw_).reshape(co * kh * kw_, 1)

    y = _conv_transpose_matmul(x3, w2, b2, budget, limit)     # (N, Co*4, H*W)
    y = y.reshape(n, co, kh, kw_, h, w)
    y = jnp.transpose(y, (0, 1, 4, 2, 5, 3))                  # (N, Co, H, kh, W, kw)
    return y.reshape(n, co, h * kh, w * kw_)


# ------------------------------ Module wrapper ------------------------------ #
class Conv2dTransposePallas:
    """Pallas equivalent of the PyTorch Conv2dTranspose module
    (nn.ConvTranspose2d with kernel_size == stride == (2, 2), no padding)."""

    def __init__(self, in_channels, out_channels, kernel_size=(2, 2),
                 stride=(2, 2), *, key=None):
        assert tuple(kernel_size) == (2, 2) and tuple(stride) == (2, 2), \
            "This kernel specializes kernel_size == stride == (2, 2)."
        if key is None:
            key = jax.random.PRNGKey(0)
        self.in_channels = in_channels
        self.out_channels = out_channels
        self.kh, self.kw = kernel_size

        kw_key, kb_key = jax.random.split(key)
        # PyTorch ConvTranspose2d weight shape: (in_channels, out_channels, kH, kW)
        # and its default init derives fan_in from out_channels * kH * kW.
        fan_in = out_channels * self.kh * self.kw
        bound = 1.0 / (fan_in ** 0.5)
        self.weight = jax.random.uniform(
            kw_key, (in_channels, out_channels, self.kh, self.kw),
            minval=-bound, maxval=bound, dtype=jnp.float32)
        self.bias = jax.random.uniform(
            kb_key, (out_channels,), minval=-bound, maxval=bound,
            dtype=jnp.float32)
        self._mode = {}

    def __call__(self, x):
        key = (tuple(x.shape), str(x.dtype))
        mode = self._mode.get(key)
        if mode == "fused":
            return _forward_fused(x, self.weight, self.bias)
        if mode == "unfused":
            return _forward_unfused(x, self.weight, self.bias)
        try:
            out = _forward_fused(x, self.weight, self.bias)
            jax.block_until_ready(out)
            self._mode[key] = "fused"
            return out
        except Exception:
            # TODO(synk): the fused pixel-shuffle relies on Mosaic lowering the
            # in-kernel stack+reshape lane interleave; if that lowering is
            # unavailable we fall back to the unfused matmul kernel.
            self._mode[key] = "unfused"
            return _forward_unfused(x, self.weight, self.bias)


# ------------------------------ Reference check ----------------------------- #
def _reference(x, weight, bias):
    # out[n, co, 2i+ki, 2j+kj] = sum_ci x[n,ci,i,j] * W[ci,co,ki,kj] + b[co]
    n, c, h, w = x.shape
    _, co, kh, kw_ = weight.shape
    y = jnp.einsum('ncij,cdkl->ndikjl', x, weight,
                   precision=jax.lax.Precision.HIGHEST)
    y = y.reshape(n, co, h * kh, w * kw_)
    return y + bias[None, :, None, None]


if __name__ == "__main__":
    key = jax.random.PRNGKey(0)
    k_in, k_mod = jax.random.split(key)

    N, Cin, Cout, H, W = 2, 4, 8, 16, 16
    x = jax.random.normal(k_in, (N, Cin, H, W), dtype=jnp.float32)

    mod = Conv2dTransposePallas(Cin, Cout, kernel_size=(2, 2), stride=(2, 2),
                                key=k_mod)
    out = jax.block_until_ready(mod(x))

    assert out.shape == (N, Cout, 2 * H, 2 * W), out.shape

    ref = _reference(x, mod.weight, mod.bias)
    assert jnp.allclose(out, ref, atol=1e-4, rtol=1e-4), \
        float(jnp.max(jnp.abs(out - ref)))

    print("KERNEL_OK")
</pallas_src>

<mosaic_0001>
module attributes {stable_mosaic.version = 11 : i64} {
  func.func @_fused_pixel_shuffle_kernel(%arg0: i32, %arg1: i32, %arg2: memref<1x4x256xf32, #tpu.memory_space<vmem>>, %arg3: memref<32x4xf32, #tpu.memory_space<vmem>>, %arg4: memref<32x1xf32, #tpu.memory_space<vmem>>, %arg5: memref<1x8x1024xf32, #tpu.memory_space<vmem>>) attributes {dimension_semantics = [#tpu.dimension_semantics<parallel>, #tpu.dimension_semantics<parallel>], iteration_bounds = array<i64: 2, 1>, scalar_prefetch = 0 : i64, scratch_operands = 0 : i64, tpu.core_type = #tpu.core_type<tc>, window_params = [{transform_indices = @transform_0, window_bounds = array<i64: 1, 4, 256>}, {pipeline_mode = #tpu.pipeline_mode<synchronous>, transform_indices = @transform_1, window_bounds = array<i64: 32, 4>}, {pipeline_mode = #tpu.pipeline_mode<synchronous>, transform_indices = @transform_2, window_bounds = array<i64: 32, 1>}, {transform_indices = @transform_3, window_bounds = array<i64: 1, 8, 1024>}]} {
    %c0 = arith.constant 0 : index
    %c0_0 = arith.constant 0 : index
    %0 = vector.load %arg3[%c0, %c0_0] : memref<32x4xf32, #tpu.memory_space<vmem>>, vector<32x4xf32>
    %c0_1 = arith.constant 0 : index
    %c0_2 = arith.constant 0 : index
    %c0_3 = arith.constant 0 : index
    %1 = vector.load %arg2[%c0_1, %c0_2, %c0_3] : memref<1x4x256xf32, #tpu.memory_space<vmem>>, vector<1x4x256xf32>
    %2 = vector.shape_cast %1 : vector<1x4x256xf32> to vector<4x256xf32>
    %cst = arith.constant dense<0.000000e+00> : vector<32x256xf32>
    %3 = tpu.matmul %0, %2, %cst {dimension_numbers = #tpu.dot_dimension_numbers<[1], [0], [0], [1], [0, 0, 1, 1], [], []>} : vector<32x4xf32>, vector<4x256xf32>, vector<32x256xf32> -> vector<32x256xf32>
    %c0_4 = arith.constant 0 : index
    %c0_5 = arith.constant 0 : index
    %4 = vector.load %arg4[%c0_4, %c0_5] : memref<32x1xf32, #tpu.memory_space<vmem>>, vector<32x1xf32>
    %5 = vector.broadcast %4 : vector<32x1xf32> to vector<32x256xf32>
    %6 = arith.addf %3, %5 : vector<32x256xf32>
    %7 = vector.extract_strided_slice %6 {offsets = [0, 0], sizes = [8, 256], strides = [1, 1]} : vector<32x256xf32> to vector<8x256xf32>
    %8 = vector.extract_strided_slice %6 {offsets = [8, 0], sizes = [8, 256], strides = [1, 1]} : vector<32x256xf32> to vector<8x256xf32>
    %9 = vector.extract_strided_slice %6 {offsets = [16, 0], sizes = [8, 256], strides = [1, 1]} : vector<32x256xf32> to vector<8x256xf32>
    %10 = vector.extract_strided_slice %6 {offsets = [24, 0], sizes = [8, 256], strides = [1, 1]} : vector<32x256xf32> to vector<8x256xf32>
    %11 = vector.shape_cast %7 : vector<8x256xf32> to vector<8x256x1xf32>
    %12 = vector.shape_cast %8 : vector<8x256xf32> to vector<8x256x1xf32>
    %13 = tpu.concatenate %11, %12 in 2 : vector<8x256x1xf32>, vector<8x256x1xf32> -> vector<8x256x2xf32>
    %14 = vector.shape_cast %13 : vector<8x256x2xf32> to vector<8x16x32xf32>
    %15 = vector.shape_cast %9 : vector<8x256xf32> to vector<8x256x1xf32>
    %16 = vector.shape_cast %10 : vector<8x256xf32> to vector<8x256x1xf32>
    %17 = tpu.concatenate %15, %16 in 2 : vector<8x256x1xf32>, vector<8x256x1xf32> -> vector<8x256x2xf32>
    %18 = vector.shape_cast %17 : vector<8x256x2xf32> to vector<8x16x32xf32>
    %19 = vector.shape_cast %14 : vector<8x16x32xf32> to vector<8x16x1x32xf32>
    %20 = vector.shape_cast %18 : vector<8x16x32xf32> to vector<8x16x1x32xf32>
    %21 = tpu.concatenate %19, %20 in 2 : vector<8x16x1x32xf32>, vector<8x16x1x32xf32> -> vector<8x16x2x32xf32>
    %22 = vector.shape_cast %21 : vector<8x16x2x32xf32> to vector<8x1024xf32>
    %c0_6 = arith.constant 0 : index
    %c0_7 = arith.constant 0 : index
    %c0_8 = arith.constant 0 : index
    %23 = vector.load %arg5[%c0_6, %c0_7, %c0_8] : memref<1x8x1024xf32, #tpu.memory_space<vmem>>, vector<1x8x1024xf32>
    %24 = vector.shape_cast %23 : vector<1x8x1024xf32> to vector<8x1024xf32>
    %25 = vector.shape_cast %22 : vector<8x1024xf32> to vector<1x8x1024xf32>
    tpu.vector_store %arg5[%c0_6, %c0_7, %c0_8], %25 {strides = array<i32>} : memref<1x8x1024xf32, #tpu.memory_space<vmem>>, vector<1x8x1024xf32>,
    return
  }
  func.func @transform_0(%arg0: i32, %arg1: i32) -> (i32, i32, i32) {
    %c0_i32 = arith.constant 0 : i32
    %c0_i32_0 = arith.constant 0 : i32
    return %arg0, %c0_i32, %arg1 : i32, i32, i32
  }
  func.func @transform_1(%arg0: i32, %arg1: i32) -> (i32, i32) {
    %c0_i32 = arith.constant 0 : i32
    %c0_i32_0 = arith.constant 0 : i32
    %c0_i32_1 = arith.constant 0 : i32
    return %c0_i32, %c0_i32_0 : i32, i32
  }
  func.func @transform_2(%arg0: i32, %arg1: i32) -> (i32, i32) {
    %c0_i32 = arith.constant 0 : i32
    %c0_i32_0 = arith.constant 0 : i32
    %c0_i32_1 = arith.constant 0 : i32
    return %c0_i32, %c0_i32_0 : i32, i32
  }
  func.func @transform_3(%arg0: i32, %arg1: i32) -> (i32, i32, i32) {
    %c0_i32 = arith.constant 0 : i32
    %c0_i32_0 = arith.constant 0 : i32
    return %arg0, %c0_i32, %arg1 : i32, i32, i32
  }
}

module attributes {stable_mosaic.version = 11 : i64} {
  func.func @_matmul_bias_kernel(%arg0: i32, %arg1: i32, %arg2: memref<1x4x256xf32, #tpu.memory_space<vmem>>, %arg3: memref<32x4xf32, #tpu.memory_space<vmem>>, %arg4: memref<32x1xf32, #tpu.memory_space<vmem>>, %arg5: memref<1x32x256xf32, #tpu.memory_space<vmem>>) attributes {dimension_semantics = [#tpu.dimension_semantics<parallel>, #tpu.dimension_semantics<parallel>], iteration_bounds = array<i64: 2, 1>, scalar_prefetch = 0 : i64, scratch_operands = 0 : i64, tpu.core_type = #tpu.core_type<tc>, window_params = [{transform_indices = @transform_0, window_bounds = array<i64: 1, 4, 256>}, {pipeline_mode = #tpu.pipeline_mode<synchronous>, transform_indices = @transform_1, window_bounds = array<i64: 32, 4>}, {pipeline_mode = #tpu.pipeline_mode<synchronous>, transform_indices = @transform_2, window_bounds = array<i64: 32, 1>}, {transform_indices = @transform_3, window_bounds = array<i64: 1, 32, 256>}]} {
    %c0 = arith.constant 0 : index
    %c0_0 = arith.constant 0 : index
    %0 = vector.load %arg3[%c0, %c0_0] : memref<32x4xf32, #tpu.memory_space<vmem>>, vector<32x4xf32>
    %c0_1 = arith.constant 0 : index
    %c0_2 = arith.constant 0 : index
    %c0_3 = arith.constant 0 : index
    %1 = vector.load %arg2[%c0_1, %c0_2, %c0_3] : memref<1x4x256xf32, #tpu.memory_space<vmem>>, vector<1x4x256xf32>
    %2 = vector.shape_cast %1 : vector<1x4x256xf32> to vector<4x256xf32>
    %cst = arith.constant dense<0.000000e+00> : vector<32x256xf32>
    %3 = tpu.matmul %0, %2, %cst {dimension_numbers = #tpu.dot_dimension_numbers<[1], [0], [0], [1], [0, 0, 1, 1], [], []>} : vector<32x4xf32>, vector<4x256xf32>, vector<32x256xf32> -> vector<32x256xf32>
    %c0_4 = arith.constant 0 : index
    %c0_5 = arith.constant 0 : index
    %4 = vector.load %arg4[%c0_4, %c0_5] : memref<32x1xf32, #tpu.memory_space<vmem>>, vector<32x1xf32>
    %5 = vector.broadcast %4 : vector<32x1xf32> to vector<32x256xf32>
    %6 = arith.addf %3, %5 : vector<32x256xf32>
    %c0_6 = arith.constant 0 : index
    %c0_7 = arith.constant 0 : index
    %c0_8 = arith.constant 0 : index
    %7 = vector.load %arg5[%c0_6, %c0_7, %c0_8] : memref<1x32x256xf32, #tpu.memory_space<vmem>>, vector<1x32x256xf32>
    %8 = vector.shape_cast %7 : vector<1x32x256xf32> to vector<32x256xf32>
    %9 = vector.shape_cast %6 : vector<32x256xf32> to vector<1x32x256xf32>
    tpu.vector_store %arg5[%c0_6, %c0_7, %c0_8], %9 {strides = array<i32>} : memref<1x32x256xf32, #tpu.memory_space<vmem>>, vector<1x32x256xf32>,
    return
  }
  func.func @transform_0(%arg0: i32, %arg1: i32) -> (i32, i32, i32) {
    %c0_i32 = arith.constant 0 : i32
    %c0_i32_0 = arith.constant 0 : i32
    return %arg0, %c0_i32, %arg1 : i32, i32, i32
  }
  func.func @transform_1(%arg0: i32, %arg1: i32) -> (i32, i32) {
    %c0_i32 = arith.constant 0 : i32
    %c0_i32_0 = arith.constant 0 : i32
    %c0_i32_1 = arith.constant 0 : i32
    return %c0_i32, %c0_i32_0 : i32, i32
  }
  func.func @transform_2(%arg0: i32, %arg1: i32) -> (i32, i32) {
    %c0_i32 = arith.constant 0 : i32
    %c0_i32_0 = arith.constant 0 : i32
    %c0_i32_1 = arith.constant 0 : i32
    return %c0_i32, %c0_i32_0 : i32, i32
  }
  func.func @transform_3(%arg0: i32, %arg1: i32) -> (i32, i32, i32) {
    %c0_i32 = arith.constant 0 : i32
    %c0_i32_0 = arith.constant 0 : i32
    return %arg0, %c0_i32, %arg1 : i32, i32, i32
  }
}

</mosaic_0001>

<bundles_post_ra>
// kernel: tile.0
= control target key start
LH: loop header
LB: loop body
LE: loop exit
PB: predicated region body
PF: predicated region fallthrough
CT: control target
= control target key end

     0   :  { %s67_s8 = smov 125   ;;  %vm8_vm0 = vcmask 7168   ;;  %s68_s11 = smov 126   ;;  %s118_s0 = inlined_call_operand.vmem [shape: f32[4,8], index: 0, kind: input, shape index: {}]   ;;  %s119_s1 = inlined_call_operand.vmem [shape: f32[32,1], index: 1, kind: output, shape index: {}]  }
   0x1   :  { %v5_v0 = vld [vmem:[%s118_s0] sm:$0xf]  ;;  %s66_s0 = smov 127   ;;  %s69_s12 = smov 124  }
   0x2   :  { %6 = vst [vmem:[#allocation0] sm:$0xf] %v5_v0  ;;  %s70_s13 = smov 123   ;;  %s71_s14 = smov 122  }
   0x3   :  { %s72_s15 = smov 121  }
   0x9   :  { %v10_v1 = vld [vmem:[#allocation0] sm:$0xf]  }
   0xa   :  { %v22_v2 = vld [vmem:[#allocation0] sm:$0xf]   ;;  %11 = vrot.lane.b32.xlu0 %v10_v1, %s66_s0 }
   0xb   :  { %23 = vrot.lane.b32.xlu1 %v22_v2, %s67_s8  ;;  %v16_v3 = vld [vmem:[#allocation0] sm:$0xf]  }
   0xc   :  { %v28_v4 = vld [vmem:[#allocation0] sm:$0xf]  }
   0xd   :  { %v7_v5 = vld [vmem:[#allocation0] sm:$0xf]  }
   0xe   :  { %9 = vst.msk [vmem:[%s119_s1] ss:$8 sm:$0xf] %vm8_vm0, %v7_v5   ;;  %17 = vrot.lane.b32.xlu0 %v16_v3, %s68_s11  ;;  %v34_v6 = vld [vmem:[#allocation0] sm:$0xf]  }
   0xf   :  { %29 = vrot.lane.b32.xlu1 %v28_v4, %s69_s12  ;;  %v40_v7 = vld [vmem:[#allocation0] sm:$0xf]  }
  0x10   :  { %v46_v8 = vld [vmem:[#allocation0] sm:$0xf]  }
  0x12   :  { %35 = vrot.lane.b32.xlu0 %v34_v6, %s70_s13 }
  0x13   :  { %41 = vrot.lane.b32.xlu1 %v40_v7, %s71_s14 }
  0x16   :  { %47 = vrot.lane.b32.xlu0 %v46_v8, %s72_s15 }
  0x7c   :  { %v12_v9 = vpop.permute.xlu0 %11  }
  0x7d   :  { %v24_v10 = vpop.permute.xlu1 %23   ;;  %52 = vst.msk [vmem:[%s119_s1 + $0x1] ss:$8 sm:$0xf] %vm8_vm0, %v12_v9  }
  0x7e   :  { %54 = vst.msk [vmem:[%s119_s1 + $0x3] ss:$8 sm:$0xf] %vm8_vm0, %v24_v10  }
  0x80   :  { %v18_v11 = vpop.permute.xlu0 %17  }
  0x81   :  { %v30_v12 = vpop.permute.xlu1 %29   ;;  %53 = vst.msk [vmem:[%s119_s1 + $0x2] ss:$8 sm:$0xf] %vm8_vm0, %v18_v11  }
  0x82   :  { %55 = vst.msk [vmem:[%s119_s1 + $0x4] ss:$8 sm:$0xf] %vm8_vm0, %v30_v12  }
  0x84   :  { %v36_v13 = vpop.permute.xlu0 %35  }
  0x85   :  { %v42_v14 = vpop.permute.xlu1 %41   ;;  %56 = vst.msk [vmem:[%s119_s1 + $0x5] ss:$8 sm:$0xf] %vm8_vm0, %v36_v13  }
  0x86   :  { %57 = vst.msk [vmem:[%s119_s1 + $0x6] ss:$8 sm:$0xf] %vm8_vm0, %v42_v14  }
  0x88   :  { %v48_v15 = vpop.permute.xlu0 %47  }
  0x89   :  { %58 = vst.msk [vmem:[%s119_s1 + $0x7] ss:$8 sm:$0xf] %vm8_vm0, %v48_v15  }

// kernel: tile.8
= control target key start
LH: loop header
LB: loop body
LE: loop exit
PB: predicated region body
PF: predicated region fallthrough
CT: control target
= control target key end

     0   :  { %s22_s0 = inlined_call_operand.vmem [shape: f32[8], index: 0, kind: input, shape index: {}]   ;;  %s23_s1 = inlined_call_operand.vmem [shape: f32[4,8], index: 1, kind: output, shape index: {}]  }
   0x1   :  { %v4_v0 = vld [vmem:[%s22_s0] ss:$0 sm:$0xff] }
   0x2   :  { %5 = vst [vmem:[%s23_s1] sm:$0xf] %v4_v0 }

// kernel: _forward_unfused.1
= control target key start
LH: loop header
LB: loop body
LE: loop exit
PB: predicated region body
PF: predicated region fallthrough
CT: control target
= control target key end

     0   :  { %s539_s12 = smov 0   ;;  %s541_s13 = smov 0   ;;  %s600_s0 = inlined_call_operand.vmem [shape: f32[2,4,256], index: 0, kind: input, shape index: {}]   ;;  %s601_s1 = inlined_call_operand.vmem [shape: f32[32,4], index: 1, kind: input, shape index: {}]   ;;  %s602_s2 = inlined_call_operand.vmem [shape: f32[32,1], index: 2, kind: input, shape index: {}]   ;;  %s603_s3 = inlined_call_operand.vmem [shape: f32[2,32,256], index: 3, kind: output, shape index: {}]  }
   0x1   :  { %s543_s14 = smov 0  }
   0x2 LB: > { %s25_s15 = sadd.s32 1, %s511_s13  ;;  %p447_p0 = scmp.ge.s32.totalorder %s515_s14, 1  ;;  %s515_s14 = sphi %s543_s14, %s13_s14   ;;  %s511_s13 = sphi %s541_s13, %s605_s13   ;;  %s507_s12 = sphi %s539_s12, %s604_s12  }
   0x3   : > { %p27_p1 = scmp.ge.s32.totalorder %s25_s15, 2  ;;  %p158_p2 = scmp.lt.s32.totalorder %s515_s14, 3 }
   0x5   : > { %s607_s15 = smov (%p27_p1, %s25_s15), 0  ;;  %p159_p3 = pnand %p447_p0, %p158_p2 }
   0x6   : > { %p191_p4 = scmp.lt.s32.totalorder (!%p159_p3), %s507_s12, 1 }
   0x7   : > { %162 = sbr.rel (%p159_p3) target bundleno = 223 (0xdf), region = 32 }
   0xc   : > { %v517_v0 = vmov 0.0   ;;  %v217_v1 = vld [vmem:[%s602_s2 + $0x10] sm:$0xff]  ;;  %s609_s12 = smov (!%p191_p4, %s507_s12), 1  ;;  %v518_v2 = vmov 0   ;;  %v215_v3 = vld [vmem:[%s602_s2] sm:$0xff]  ;;  %v218_v4 = vld [vmem:[%s602_s2 + $0x18] sm:$0xff] }
   0xd   : > { %323 = vmatprep.mubr.f32.mxu0 %v517_v0  ;;  %335 = vmatprep.mubr.f32.mxu1 %v517_v0  ;;  %s460_s20 = sshll.u32 %s609_s12, 3  ;;  %v216_v5 = vld [vmem:[%s602_s2 + $0x8] sm:$0xff]  ;;  %vm254_vm0 = vcmask 1043456   ;;  %v210_v8 = vld [vmem:[%s601_s1] sm:$0xff]  ;;  %vm241_vm1 = vcmask 31744   ;;  %v212_v9 = vld [vmem:[%s601_s1 + $0x10] sm:$0xff] }
   0xe   : > { %491 = vset.pattern.permute.xlu1 %v518_v2  ;;  %490 = vset.pattern.permute.xlu0 %v518_v2  ;;  %s198_s27 = scalar_lea.vmem %s600_s0, %s460_s20  ;;  %v211_v10 = vld [vmem:[%s601_s1 + $0x8] sm:$0xff]  ;;  %v213_v11 = vld [vmem:[%s601_s1 + $0x18] sm:$0xff]  ;;  %s461_s9 = sshll.u32 %s609_s12, 6 }
   0xf   : > { %231 = vperm.xlu1 %491, %v217_v1   ;;  %221 = vperm.xlu0 %490, %v215_v3   ;;  %v214_v6 = vld [vmem:[%s198_s27] sm:$0xff]  ;;  %s208_s16 = scalar_lea.vmem %s603_s3, %s461_s9 }
  0x10   : > { %v240_v7 = vcombine.high %v214_v6, %v214_v6 }
  0x12   : > { %452 = vmatprep.subr.msk.mxu0 %vm254_vm0, %v240_v7  ;;  %462 = vmatprep.subr.msk.mxu1 %vm254_vm0, %v240_v7 }
  0x13   : > { %236 = vperm.xlu1 %491, %v218_v4   ;;  %226 = vperm.xlu0 %490, %v216_v5  }
  0x14   : > { %453 = vmatpush1.msk.msra.mxu0 %vm254_vm0, %v214_v6  ;;  %463 = vmatpush1.msk.msra.mxu1 %vm254_vm0, %v214_v6 }
  0x15   : > { %454 = vmatmul.mubr.msk.f32.vlgmr.msra.gmra.mxu0 %vm241_vm1, %v210_v8  ;;  %456 = vmatmul.mubr.msk.f32.vlgmr.msra.gmra.mxu1 %vm241_vm1, %v212_v9 }
  0x16   : > { %329 = vmatprep.mubr.f32.mxu0 %v517_v0  ;;  %341 = vmatprep.mubr.f32.mxu1 %v517_v0 }
  0x19   : > { %455 = vmatmul.mubr.msk.f32.gmra.mxu0 %vm241_vm1, %v211_v10  ;;  %457 = vmatmul.mubr.msk.f32.gmra.mxu1 %vm241_vm1, %v213_v11 }
  0x8a   : > { %v232_v12 = vpop.permute.xlu1 %231  ;;  %v222_v13 = vpop.permute.xlu0 %221 }
  0x8e   : > { %v237_v20 = vpop.permute.xlu1 %236  ;;  %v227_v21 = vpop.permute.xlu0 %226 }
  0xd5   : > { %v325_v14 = vpop.f32.mrf.mxu0  ;;  %v337_v15 = vpop.f32.mrf.mxu1 }
  0xd6   : > { %v326_v16 = vadd.f32 %v325_v14, %v222_v13  ;;  %v338_v17 = vadd.f32 %v337_v15, %v232_v12 }
  0xd7   : > { %v327_v18 = vpop.f32.mrf.mxu0  ;;  %v339_v19 = vpop.f32.mrf.mxu1 }
  0xd8   : > { %348 = vst [vmem:[%s208_s16] sm:$0xff] %v326_v16  ;;  %352 = vst [vmem:[%s208_s16 + $0x20] sm:$0xff] %v338_v17  ;;  %v328_v22 = vadd.f32 %v327_v18, %v222_v13  ;;  %v340_v23 = vadd.f32 %v339_v19, %v232_v12 }
  0xd9   : > { %v331_v24 = vpop.f32.mrf.mxu0  ;;  %v343_v25 = vpop.f32.mrf.mxu1 }
  0xda   : > { %349 = vst [vmem:[%s208_s16 + $0x8] sm:$0xff] %v328_v22  ;;  %353 = vst [vmem:[%s208_s16 + $0x28] sm:$0xff] %v340_v23  ;;  %v332_v26 = vadd.f32 %v331_v24, %v227_v21  ;;  %v344_v27 = vadd.f32 %v343_v25, %v237_v20 }
  0xdb   : > { %v333_v28 = vpop.f32.mrf.mxu0  ;;  %v345_v29 = vpop.f32.mrf.mxu1 }
  0xdc   : > { %350 = vst [vmem:[%s208_s16 + $0x10] sm:$0xff] %v332_v26  ;;  %354 = vst [vmem:[%s208_s16 + $0x30] sm:$0xff] %v344_v27  ;;  %v334_v30 = vadd.f32 %v333_v28, %v227_v21  ;;  %v346_v31 = vadd.f32 %v345_v29, %v237_v20 }
  0xde   : > { %351 = vst [vmem:[%s208_s16 + $0x18] sm:$0xff] %v334_v30  ;;  %355 = vst [vmem:[%s208_s16 + $0x38] sm:$0xff] %v346_v31 }
  0xdf PF: > { %s13_s14 = sadd.s32 1, %s515_s14   ;;  %s604_s12 = smov %s511_s13 }
  0xe0   : > { %p10_p5 = scmp.ge.s32.totalorder %s13_s14, 4   ;;  %s605_s13 = smov %s607_s15 }
  0xe2   :  { %12 = sbr.rel (!%p10_p5) target bundleno = 2 (0x2), region = 62 }

</bundles_post_ra>
